<compile_context>
chip_gen: v7x
topology: tpu7x:2x2x1
jax: 0.10.0
libtpu: 0.0.40
codegen_flags: <defaults>
</compile_context>

<pallas_src>
import jax
import jax.numpy as jnp
from jax.experimental import pallas as pl
from jax.experimental.pallas import tpu as pltpu

_EPS = 1e-12     # torch.nn.functional.normalize epsilon
_PAD = 256       # a2b / b2a are padded or truncated to this many features


def _elu(x):
    # ELU(alpha=1): x for x > 0, exp(x) - 1 otherwise.
    return jnp.where(x > 0, x, jnp.exp(jnp.minimum(x, 0.0)) - 1.0)


# --------------------------------------------------------------------------- #
# Kernel 1: per-batch bilinear scores + padded a2b / b2a reductions.
# --------------------------------------------------------------------------- #
def _scores_kernel(rels_ref, rel_ref, h_ref, t_ref, alpha_ref, a2b_ref, b2a_ref):
    del rels_ref  # only consumed by the data-dependent index_maps
    Nh = h_ref.shape[1]
    Nt = t_ref.shape[1]

    R = rel_ref[0]        # (F, F) — relation already gathered by the BlockSpec
    h = h_ref[0]          # (Nh, F)
    t = t_ref[0]          # (Nt, F)

    # F.normalize: x / max(||x||_2, eps).  Relation is normalized over flat F*F.
    r_norm = jnp.sqrt(jnp.sum(R * R))
    Rn = R / jnp.maximum(r_norm, _EPS)
    hn = h / jnp.maximum(jnp.sqrt(jnp.sum(h * h, axis=-1, keepdims=True)), _EPS)
    tn = t / jnp.maximum(jnp.sqrt(jnp.sum(t * t, axis=-1, keepdims=True)), _EPS)

    # MXU matmuls; the (Nh, Nt) scores block stays in VMEM only.
    hr = jnp.dot(hn, Rn, preferred_element_type=jnp.float32)            # (Nh, F)
    scores = jnp.dot(hr, tn.T, preferred_element_type=jnp.float32)       # (Nh, Nt)
    scores = scores * alpha_ref[0]

    # Sublane (VPU) reductions; one small XLU transpose keeps a2b in row layout.
    b2a_row = jnp.sum(scores, axis=0, keepdims=True)                     # (1, Nt)
    a2b_row = jnp.sum(scores.T, axis=0, keepdims=True)                   # (1, Nh)
    total = jnp.sum(scores)                                              # scalar

    def write_padded(out_ref, row):
        n = row.shape[-1]
        if n >= _PAD:
            out_ref[0] = row[:, :_PAD].astype(out_ref.dtype)
        else:
            # Fill the lane-dense 256-wide row with the total score (unmasked
            # store), then overwrite the leading n lanes with the reduction.
            out_ref[0] = jnp.full((1, _PAD), total, dtype=out_ref.dtype)
            out_ref[0, :, :n] = row.astype(out_ref.dtype)

    write_padded(a2b_ref, a2b_row)
    write_padded(b2a_ref, b2a_row)


# --------------------------------------------------------------------------- #
# Kernel 2: 3-layer ELU FFN over the whole batch (weights loaded once).
# --------------------------------------------------------------------------- #
def _ffn_kernel(x_ref, w1_ref, b1_ref, w2_ref, b2_ref, w3_ref, b3_ref, o_ref):
    x = x_ref[...]
    h = _elu(jnp.dot(x, w1_ref[...], preferred_element_type=jnp.float32) + b1_ref[...])
    h = _elu(jnp.dot(h, w2_ref[...], preferred_element_type=jnp.float32) + b2_ref[...])
    o_ref[...] = (jnp.dot(h, w3_ref[...], preferred_element_type=jnp.float32)
                  + b3_ref[...]).astype(o_ref.dtype)


def _ffn_forward(x, p):
    B = x.shape[0]
    d_out = p["w3"].shape[1]
    vmem = pl.BlockSpec(memory_space=pltpu.MemorySpace.VMEM)
    return pl.pallas_call(
        _ffn_kernel,
        out_shape=jax.ShapeDtypeStruct((B, d_out), jnp.float32),
        in_specs=[vmem] * 7,
        out_specs=vmem,
    )(x, p["w1"], p["b1"], p["w2"], p["b2"], p["w3"], p["b3"])


# --------------------------------------------------------------------------- #
# Full forward wrapper.
# --------------------------------------------------------------------------- #
def rescal_forward(heads, tails, rels, alpha_scores, params):
    heads = heads.astype(jnp.float32)
    tails = tails.astype(jnp.float32)
    B, Nh, F_ = heads.shape
    _, Nt, _ = tails.shape

    rel_w = params["rel_emb"].reshape(-1, F_, F_)   # (n_rels, F, F)
    rels = rels.astype(jnp.int32)
    if alpha_scores is None:
        # TODO(synk): specialize a no-alpha kernel variant instead of streaming ones.
        alpha_scores = jnp.ones((B, Nh, Nt), dtype=jnp.float32)
    alpha_scores = alpha_scores.astype(jnp.float32)

    a2b_pad, b2a_pad = pl.pallas_call(
        _scores_kernel,
        out_shape=(
            jax.ShapeDtypeStruct((B, 1, _PAD), jnp.float32),
            jax.ShapeDtypeStruct((B, 1, _PAD), jnp.float32),
        ),
        grid_spec=pltpu.PrefetchScalarGridSpec(
            num_scalar_prefetch=1,           # relation ids live in SMEM
            grid=(B,),
            in_specs=[
                # relation matrix gathered per batch element (data-dependent)
                pl.BlockSpec((1, F_, F_), lambda b, r: (r[b], 0, 0)),
                pl.BlockSpec((1, Nh, F_), lambda b, r: (b, 0, 0)),
                pl.BlockSpec((1, Nt, F_), lambda b, r: (b, 0, 0)),
                pl.BlockSpec((1, Nh, Nt), lambda b, r: (b, 0, 0)),
            ],
            out_specs=[
                pl.BlockSpec((1, 1, _PAD), lambda b, r: (b, 0, 0)),
                pl.BlockSpec((1, 1, _PAD), lambda b, r: (b, 0, 0)),
            ],
        ),
        compiler_params=pltpu.CompilerParams(dimension_semantics=("parallel",)),
    )(rels, rel_w, heads, tails, alpha_scores)

    a2b_pad = a2b_pad.reshape(B, _PAD)
    b2a_pad = b2a_pad.reshape(B, _PAD)

    out_a = _ffn_forward(a2b_pad, params["a2b_mlp"])
    out_b = _ffn_forward(b2a_pad, params["b2a_mlp"])
    return jnp.concatenate([out_a, out_b], axis=-1)


# --------------------------------------------------------------------------- #
# Pure-JAX reference + parameter init + demo.
# --------------------------------------------------------------------------- #
def rescal_reference(heads, tails, rels, alpha_scores, params):
    hp = jax.lax.Precision.HIGHEST
    F_ = params["n_features"]
    rel = params["rel_emb"][rels]
    rel = rel / jnp.maximum(jnp.linalg.norm(rel, axis=-1, keepdims=True), _EPS)
    hn = heads / jnp.maximum(jnp.linalg.norm(heads, axis=-1, keepdims=True), _EPS)
    tn = tails / jnp.maximum(jnp.linalg.norm(tails, axis=-1, keepdims=True), _EPS)
    R = rel.reshape(-1, F_, F_)
    scores = jnp.einsum("bnf,bfg,bmg->bnm", hn, R, tn, precision=hp)
    if alpha_scores is not None:
        scores = alpha_scores * scores
    a2b = scores.sum(-1)
    b2a = scores.sum(-2)
    tot = scores.sum((-2, -1))

    def pad(x):
        n = x.shape[1]
        if n >= _PAD:
            return x[:, :_PAD]
        return jnp.concatenate([x, jnp.repeat(tot[:, None], _PAD - n, axis=1)], axis=1)

    def ffn(x, p):
        h = _elu(jnp.dot(x, p["w1"], precision=hp) + p["b1"])
        h = _elu(jnp.dot(h, p["w2"], precision=hp) + p["b2"])
        return jnp.dot(h, p["w3"], precision=hp) + p["b3"]

    return jnp.concatenate(
        [ffn(pad(a2b), params["a2b_mlp"]), ffn(pad(b2a), params["b2a_mlp"])], axis=-1)


def _xavier_uniform(key, shape, fan_in, fan_out):
    bound = (6.0 / (fan_in + fan_out)) ** 0.5
    return jax.random.uniform(key, shape, jnp.float32, -bound, bound)


def init_params(key, n_rels, n_features):
    H = n_features
    ks = jax.random.split(key, 3)

    def ffn_params(k):
        kk = jax.random.split(k, 6)
        d1, d2, d3 = 4 * H, 2 * H, H
        return {
            "w1": _xavier_uniform(kk[0], (_PAD, d1), _PAD, d1),
            "b1": jax.random.uniform(kk[1], (1, d1), jnp.float32, -0.05, 0.05),
            "w2": _xavier_uniform(kk[2], (d1, d2), d1, d2),
            "b2": jax.random.uniform(kk[3], (1, d2), jnp.float32, -0.05, 0.05),
            "w3": _xavier_uniform(kk[4], (d2, d3), d2, d3),
            "b3": jax.random.uniform(kk[5], (1, d3), jnp.float32, -0.05, 0.05),
        }

    return {
        "n_features": n_features,
        "rel_emb": _xavier_uniform(ks[0], (n_rels, H * H), H * H, n_rels),
        "a2b_mlp": ffn_params(ks[1]),
        "b2a_mlp": ffn_params(ks[2]),
    }


if __name__ == "__main__":
    B, Nh, Nt = 2, 8, 16
    n_features = 32
    n_rels = 5

    key = jax.random.PRNGKey(0)
    k_h, k_t, k_r, k_a, k_p = jax.random.split(key, 5)

    heads = jax.random.normal(k_h, (B, Nh, n_features), jnp.float32)
    tails = jax.random.normal(k_t, (B, Nt, n_features), jnp.float32)
    rels = jax.random.randint(k_r, (B,), 0, n_rels, dtype=jnp.int32)
    alpha = jax.random.uniform(k_a, (B, Nh, Nt), jnp.float32)
    params = init_params(k_p, n_rels, n_features)

    out = rescal_forward(heads, tails, rels, alpha, params)
    out = jax.block_until_ready(out)

    ref = rescal_reference(heads, tails, rels, alpha, params)
    assert out.shape == (B, 2 * n_features), out.shape
    max_err = float(jnp.max(jnp.abs(out - ref)))
    assert jnp.allclose(out, ref, atol=2e-2, rtol=2e-2), f"max abs err {max_err}"

    print("KERNEL_OK")
</pallas_src>

<mosaic_0001>
module attributes {stable_mosaic.version = 11 : i64} {
  func.func @_scores_kernel(%arg0: i32, %arg1: memref<2xi32, #tpu.memory_space<smem>>, %arg2: memref<1x32x32xf32, #tpu.memory_space<vmem>>, %arg3: memref<1x8x32xf32, #tpu.memory_space<vmem>>, %arg4: memref<1x16x32xf32, #tpu.memory_space<vmem>>, %arg5: memref<1x8x16xf32, #tpu.memory_space<vmem>>, %arg6: memref<1x1x256xf32, #tpu.memory_space<vmem>>, %arg7: memref<1x1x256xf32, #tpu.memory_space<vmem>>) attributes {dimension_semantics = [#tpu.dimension_semantics<parallel>], iteration_bounds = array<i64: 2>, scalar_prefetch = 1 : i64, scratch_operands = 0 : i64, tpu.core_type = #tpu.core_type<tc>, window_params = [{transform_indices = @transform_0, window_bounds = array<i64: 1, 32, 32>}, {transform_indices = @transform_1, window_bounds = array<i64: 1, 8, 32>}, {transform_indices = @transform_2, window_bounds = array<i64: 1, 16, 32>}, {transform_indices = @transform_3, window_bounds = array<i64: 1, 8, 16>}, {transform_indices = @transform_4, window_bounds = array<i64: 1, 1, 256>}, {transform_indices = @transform_5, window_bounds = array<i64: 1, 1, 256>}]} {
    %c0 = arith.constant 0 : index
    %c0_0 = arith.constant 0 : index
    %c0_1 = arith.constant 0 : index
    %0 = vector.load %arg2[%c0, %c0_0, %c0_1] : memref<1x32x32xf32, #tpu.memory_space<vmem>>, vector<1x32x32xf32>
    %1 = vector.shape_cast %0 : vector<1x32x32xf32> to vector<32x32xf32>
    %c0_2 = arith.constant 0 : index
    %c0_3 = arith.constant 0 : index
    %c0_4 = arith.constant 0 : index
    %2 = vector.load %arg3[%c0_2, %c0_3, %c0_4] : memref<1x8x32xf32, #tpu.memory_space<vmem>>, vector<1x8x32xf32>
    %3 = vector.shape_cast %2 : vector<1x8x32xf32> to vector<8x32xf32>
    %c0_5 = arith.constant 0 : index
    %c0_6 = arith.constant 0 : index
    %c0_7 = arith.constant 0 : index
    %4 = vector.load %arg4[%c0_5, %c0_6, %c0_7] : memref<1x16x32xf32, #tpu.memory_space<vmem>>, vector<1x16x32xf32>
    %5 = vector.shape_cast %4 : vector<1x16x32xf32> to vector<16x32xf32>
    %6 = arith.mulf %1, %1 : vector<32x32xf32>
    %7 = vector.shape_cast %6 : vector<32x32xf32> to vector<1x32x32xf32>
    %cst = arith.constant dense<0.000000e+00> : vector<1xf32>
    %8 = vector.multi_reduction <add>, %7, %cst [1, 2] : vector<1x32x32xf32> to vector<1xf32>
    %9 = vector.shape_cast %8 : vector<1xf32> to vector<1x1x1xf32>
    %10 = vector.extract %9[0, 0, 0] : f32 from vector<1x1x1xf32>
    %11 = math.sqrt %10 : f32
    %cst_8 = arith.constant 9.99999996E-13 : f32
    %12 = arith.maximumf %11, %cst_8 : f32
    %13 = vector.broadcast %12 : f32 to vector<32x32xf32>
    %14 = arith.divf %1, %13 : vector<32x32xf32>
    %15 = arith.mulf %3, %3 : vector<8x32xf32>
    %cst_9 = arith.constant dense<0.000000e+00> : vector<8xf32>
    %16 = vector.multi_reduction <add>, %15, %cst_9 [1] : vector<8x32xf32> to vector<8xf32>
    %17 = vector.shape_cast %16 : vector<8xf32> to vector<8x1xf32>
    %18 = math.sqrt %17 : vector<8x1xf32>
    %cst_10 = arith.constant 9.99999996E-13 : f32
    %19 = vector.broadcast %cst_10 : f32 to vector<8x1xf32>
    %20 = arith.maximumf %18, %19 : vector<8x1xf32>
    %21 = vector.broadcast %20 : vector<8x1xf32> to vector<8x32xf32>
    %22 = arith.divf %3, %21 : vector<8x32xf32>
    %23 = arith.mulf %5, %5 : vector<16x32xf32>
    %cst_11 = arith.constant dense<0.000000e+00> : vector<16xf32>
    %24 = vector.multi_reduction <add>, %23, %cst_11 [1] : vector<16x32xf32> to vector<16xf32>
    %25 = vector.shape_cast %24 : vector<16xf32> to vector<16x1xf32>
    %26 = math.sqrt %25 : vector<16x1xf32>
    %cst_12 = arith.constant 9.99999996E-13 : f32
    %27 = vector.broadcast %cst_12 : f32 to vector<16x1xf32>
    %28 = arith.maximumf %26, %27 : vector<16x1xf32>
    %29 = vector.broadcast %28 : vector<16x1xf32> to vector<16x32xf32>
    %30 = arith.divf %5, %29 : vector<16x32xf32>
    %cst_13 = arith.constant dense<0.000000e+00> : vector<8x32xf32>
    %31 = tpu.matmul %22, %14, %cst_13 {dimension_numbers = #tpu.dot_dimension_numbers<[1], [0], [0], [1], [0, 0, 1, 1], [], []>} : vector<8x32xf32>, vector<32x32xf32>, vector<8x32xf32> -> vector<8x32xf32>
    %32 = tpu.transpose %30, [1, 0] : vector<16x32xf32> -> vector<32x16xf32>
    %cst_14 = arith.constant dense<0.000000e+00> : vector<8x16xf32>
    %33 = tpu.matmul %31, %32, %cst_14 {dimension_numbers = #tpu.dot_dimension_numbers<[1], [0], [0], [1], [0, 0, 1, 1], [], []>} : vector<8x32xf32>, vector<32x16xf32>, vector<8x16xf32> -> vector<8x16xf32>
    %c0_15 = arith.constant 0 : index
    %c0_16 = arith.constant 0 : index
    %c0_17 = arith.constant 0 : index
    %34 = vector.load %arg5[%c0_15, %c0_16, %c0_17] : memref<1x8x16xf32, #tpu.memory_space<vmem>>, vector<1x8x16xf32>
    %35 = vector.shape_cast %34 : vector<1x8x16xf32> to vector<8x16xf32>
    %36 = arith.mulf %33, %35 : vector<8x16xf32>
    %cst_18 = arith.constant dense<0.000000e+00> : vector<16xf32>
    %37 = vector.multi_reduction <add>, %36, %cst_18 [0] : vector<8x16xf32> to vector<16xf32>
    %38 = vector.shape_cast %37 : vector<16xf32> to vector<1x16xf32>
    %39 = tpu.transpose %36, [1, 0] : vector<8x16xf32> -> vector<16x8xf32>
    %cst_19 = arith.constant dense<0.000000e+00> : vector<8xf32>
    %40 = vector.multi_reduction <add>, %39, %cst_19 [0] : vector<16x8xf32> to vector<8xf32>
    %41 = vector.shape_cast %40 : vector<8xf32> to vector<1x8xf32>
    %42 = vector.shape_cast %36 : vector<8x16xf32> to vector<1x8x16xf32>
    %cst_20 = arith.constant dense<0.000000e+00> : vector<1xf32>
    %43 = vector.multi_reduction <add>, %42, %cst_20 [1, 2] : vector<1x8x16xf32> to vector<1xf32>
    %44 = vector.shape_cast %43 : vector<1xf32> to vector<1x1x1xf32>
    %45 = vector.extract %44[0, 0, 0] : f32 from vector<1x1x1xf32>
    %46 = vector.broadcast %45 : f32 to vector<1x256xf32>
    %c0_21 = arith.constant 0 : index
    %c0_22 = arith.constant 0 : index
    %c0_23 = arith.constant 0 : index
    %47 = vector.load %arg6[%c0_21, %c0_22, %c0_23] : memref<1x1x256xf32, #tpu.memory_space<vmem>>, vector<1x1x256xf32>
    %48 = vector.shape_cast %47 : vector<1x1x256xf32> to vector<1x256xf32>
    %49 = vector.shape_cast %46 : vector<1x256xf32> to vector<1x1x256xf32>
    tpu.vector_store %arg6[%c0_21, %c0_22, %c0_23], %49 {strides = array<i32>} : memref<1x1x256xf32, #tpu.memory_space<vmem>>, vector<1x1x256xf32>,
    %c0_24 = arith.constant 0 : index
    %c0_25 = arith.constant 0 : index
    %c0_26 = arith.constant 0 : index
    %50 = vector.load %arg6[%c0_24, %c0_25, %c0_26] : memref<1x1x256xf32, #tpu.memory_space<vmem>>, vector<1x1x8xf32>
    %51 = vector.shape_cast %50 : vector<1x1x8xf32> to vector<1x8xf32>
    %52 = vector.shape_cast %41 : vector<1x8xf32> to vector<1x1x8xf32>
    tpu.vector_store %arg6[%c0_24, %c0_25, %c0_26], %52 {strides = array<i32>} : memref<1x1x256xf32, #tpu.memory_space<vmem>>, vector<1x1x8xf32>,
    %53 = vector.broadcast %45 : f32 to vector<1x256xf32>
    %c0_27 = arith.constant 0 : index
    %c0_28 = arith.constant 0 : index
    %c0_29 = arith.constant 0 : index
    %54 = vector.load %arg7[%c0_27, %c0_28, %c0_29] : memref<1x1x256xf32, #tpu.memory_space<vmem>>, vector<1x1x256xf32>
    %55 = vector.shape_cast %54 : vector<1x1x256xf32> to vector<1x256xf32>
    %56 = vector.shape_cast %53 : vector<1x256xf32> to vector<1x1x256xf32>
    tpu.vector_store %arg7[%c0_27, %c0_28, %c0_29], %56 {strides = array<i32>} : memref<1x1x256xf32, #tpu.memory_space<vmem>>, vector<1x1x256xf32>,
    %c0_30 = arith.constant 0 : index
    %c0_31 = arith.constant 0 : index
    %c0_32 = arith.constant 0 : index
    %57 = vector.load %arg7[%c0_30, %c0_31, %c0_32] : memref<1x1x256xf32, #tpu.memory_space<vmem>>, vector<1x1x16xf32>
    %58 = vector.shape_cast %57 : vector<1x1x16xf32> to vector<1x16xf32>
    %59 = vector.shape_cast %38 : vector<1x16xf32> to vector<1x1x16xf32>
    tpu.vector_store %arg7[%c0_30, %c0_31, %c0_32], %59 {strides = array<i32>} : memref<1x1x256xf32, #tpu.memory_space<vmem>>, vector<1x1x16xf32>,
    return
  }
  func.func @transform_0(%arg0: i32, %arg1: memref<2xi32, #tpu.memory_space<smem>>) -> (i32, i32, i32) {
    %0 = arith.index_cast %arg0 : i32 to index
    %1 = memref.load %arg1[%0] : memref<2xi32, #tpu.memory_space<smem>>
    %c0_i32 = arith.constant 0 : i32
    %c0_i32_0 = arith.constant 0 : i32
    %c0_i32_1 = arith.constant 0 : i32
    return %1, %c0_i32, %c0_i32_0 : i32, i32, i32
  }
  func.func @transform_1(%arg0: i32, %arg1: memref<2xi32, #tpu.memory_space<smem>>) -> (i32, i32, i32) {
    %c0_i32 = arith.constant 0 : i32
    %c0_i32_0 = arith.constant 0 : i32
    %c0_i32_1 = arith.constant 0 : i32
    return %arg0, %c0_i32, %c0_i32_0 : i32, i32, i32
  }
  func.func @transform_2(%arg0: i32, %arg1: memref<2xi32, #tpu.memory_space<smem>>) -> (i32, i32, i32) {
    %c0_i32 = arith.constant 0 : i32
    %c0_i32_0 = arith.constant 0 : i32
    %c0_i32_1 = arith.constant 0 : i32
    return %arg0, %c0_i32, %c0_i32_0 : i32, i32, i32
  }
  func.func @transform_3(%arg0: i32, %arg1: memref<2xi32, #tpu.memory_space<smem>>) -> (i32, i32, i32) {
    %c0_i32 = arith.constant 0 : i32
    %c0_i32_0 = arith.constant 0 : i32
    %c0_i32_1 = arith.constant 0 : i32
    return %arg0, %c0_i32, %c0_i32_0 : i32, i32, i32
  }
  func.func @transform_4(%arg0: i32, %arg1: memref<2xi32, #tpu.memory_space<smem>>) -> (i32, i32, i32) {
    %c0_i32 = arith.constant 0 : i32
    %c0_i32_0 = arith.constant 0 : i32
    %c0_i32_1 = arith.constant 0 : i32
    return %arg0, %c0_i32, %c0_i32_0 : i32, i32, i32
  }
  func.func @transform_5(%arg0: i32, %arg1: memref<2xi32, #tpu.memory_space<smem>>) -> (i32, i32, i32) {
    %c0_i32 = arith.constant 0 : i32
    %c0_i32_0 = arith.constant 0 : i32
    %c0_i32_1 = arith.constant 0 : i32
    return %arg0, %c0_i32, %c0_i32_0 : i32, i32, i32
  }
}

</mosaic_0001>

<bundles_post_ra>
// kernel: tpu_custom_call.1
= control target key start
LH: loop header
LB: loop body
LE: loop exit
PB: predicated region body
PF: predicated region fallthrough
CT: control target
= control target key end

     0   :  { %s1864_s0 = inlined_call_operand.hbm [shape: s32[2], index: 0, kind: input, shape index: {}]   ;;  %s1865_s1 = inlined_call_operand.hbm [shape: f32[5,32,32], index: 1, kind: input, shape index: {}]   ;;  %s1866_s2 = inlined_call_operand.hbm [shape: f32[2,8,32], index: 2, kind: input, shape index: {}]   ;;  %s1867_s3 = inlined_call_operand.hbm [shape: f32[2,16,32], index: 3, kind: input, shape index: {}]   ;;  %s1868_s4 = inlined_call_operand.hbm [shape: f32[2,8,16], index: 4, kind: input, shape index: {}]   ;;  %s1869_s5 = inlined_call_operand.hbm [shape: f32[2,1,256], index: 5, kind: output, shape index: {0}]   ;;  %s1870_s6 = inlined_call_operand.hbm [shape: f32[2,1,256], index: 6, kind: output, shape index: {1}]  }
   0x1   :  { %1892 = sst [smem:[#allocation31_spill]] %s1866_s2  ;;  %s1083_s23 = scalar_lea.hbm %s1864_s0, 16 }
   0x2   :  { %1893 = sst [smem:[#allocation32_spill]] %s1867_s3  ;;  %p1084_p0 = scmp.ne.s32.totalorder %s1864_s0, %s1083_s23 }
   0x3   :  { %1894 = sst [smem:[#allocation33_spill]] %s1869_s5  ;;  %p1087_p1 = scmp.lt.u32.totalorder %s1083_s23, %s1864_s0 }
   0x4   :  { %1895 = sst [smem:[#allocation34_spill]] %s1870_s6 }
   0x5   :  { %p1089_p2 = pnand %p1087_p1, %p1084_p0 }
   0x7   :  { %1092 = shalt.err (!%p1089_p2)  }
   0x8   :  { %s1347_s28 = smov [#allocation3]  }
   0x9   :  { %13 = dma.hbm_to_smem %s1864_s0, 16, %s1347_s28, [#allocation2] }
   0xa   :  { %1297 = dma.done.wait [#allocation2], 16 }
   0xb   :  { %1298 = vsyncadd [#allocation2], 4294967280 }
   0xc   :  { %15 = sfence }
   0xd   :  { %16 = vsyncpa [#allocation5], 0 }
   0xe   :  { %18 = vsyncpa [#allocation5 + $0x1], 0 }
   0xf   :  { %19 = vsyncpa [#allocation8], 0 }
  0x10   :  { %21 = vsyncpa [#allocation8 + $0x1], 0 }
  0x11   :  { %22 = vsyncpa [#allocation11], 0 }
  0x12   :  { %24 = vsyncpa [#allocation11 + $0x1], 0 }
  0x13   :  { %25 = vsyncpa [#allocation6], 0 }
  0x14   :  { %27 = vsyncpa [#allocation6 + $0x1], 0 }
  0x15   :  { %28 = vsyncpa [#allocation14], 0 }
  0x16   :  { %30 = vsyncpa [#allocation14 + $0x1], 0  ;;  %s1407_s7 = smov 0   ;;  %s1409_s8 = smov 0  }
  0x17   :  { %s1411_s9 = smov 0   ;;  %s1413_s0 = smov 0  }
  0x18   :  { %s1415_s10 = smov 0   ;;  %s1417_s11 = smov 0  }
  0x19   :  { %s1419_s12 = smov 0  }
  0x1a LB: > { %1896 = sst [smem:[#allocation23_spill]] %s1321_s7  ;;  %s1441_s13 = sadd.s32 4294967295, %s1345_s12   ;;  %s1345_s12 = sphi %s1419_s12, %s1939_s12   ;;  %s1341_s11 = sphi %s1417_s11, %s1947_s11   ;;  %s1337_s10 = sphi %s1415_s10, %s1946_s10   ;;  %s1333_s0 = sphi %s1413_s0, %s1945_s0   ;;  %s1329_s9 = sphi %s1411_s9, %s1941_s9   ;;  %s1325_s8 = sphi %s1409_s8, %s1944_s8   ;;  %s1321_s7 = sphi %s1407_s7, %s1943_s7  }
  0x1b   : > { %1897 = sst [smem:[#allocation24_spill]] %s1329_s9  ;;  %s1444_s14 = sadd.s32 1, %s1345_s12  }
  0x1c   : > { %1898 = sst [smem:[#allocation25_spill]] %s1444_s14  ;;  %s888_s16 = sadd.s32 4294967294, %s1345_s12  }
  0x1d   : > { %s40_s15 = sld [smem:[#allocation3 + %s1345_s12]]  ;;  %s45_s18 = sadd.s32 1, %s1341_s11 }
  0x1e   : > { %s41_s17 = sld [smem:[#allocation3 + %s1444_s14]]  ;;  %p58_p4 = scmp.ne.s32.totalorder %s1337_s10, %s1333_s0 }
  0x1f   : > { %p59_p5 = scmp.eq.s32.totalorder %s1441_s13, 0  ;;  %p1871_p6 = scmp.eq.s32.totalorder %s1345_s12, 0 }
  0x20   : > { %s68_s19 = ssub.s32 %s1345_s12, %s1444_s14  ;;  %s71_s21 = sadd.s32 1, %s1329_s9 }
  0x21   : > { %p1459_p7 = por %p59_p5, %p58_p4  ;;  %p69_p8 = scmp.eq.s32.totalorder %s68_s19, 0 }
  0x22   : > { %p78_p9 = scmp.ne.s32.totalorder %s1329_s9, %s1325_s8  ;;  %p84_p10 = scmp.ne.s32.totalorder %s1325_s8, %s1321_s7 }
  0x23   : > { %s1899_s20 = scalar_select %p1459_p7, 1, 0 }
  0x24   : > { %s42_s22 = ssub.s32 %s40_s15, %s41_s17  ;;  %p1470_p12 = por %p78_p9, %p1871_p6 }
  0x25   : > { %p43_p11 = scmp.eq.s32.totalorder %s42_s22, 0  ;;  %p1482_p13 = por %p84_p10, %p59_p5 }
  0x26   : > { %s1475_s24 = scalar_select %p69_p8, %s1329_s9, %s71_s21  }
  0x27   : > { %s1478_s25 = scalar_select %p43_p11, %s1341_s11, %s45_s18  }
  0x28   : > { %1901 = sst [smem:[#allocation26_spill]] %s1475_s24  ;;  %p160_p0 = scmp.eq.s32.totalorder %s1441_s13, 1 }
  0x29   : > { %1902 = sst [smem:[#allocation27_spill]] %s1478_s25  ;;  %p166_p1 = scmp.eq.s32.totalorder %s888_s16, 1 }
  0x2a   : > { %s1903_s26 = scalar_select %p1482_p13, 1, 0 }
  0x2b   : > { %p1488_p4 = por %p160_p0, %p78_p9  ;;  %p1875_p6 = scmp.lt.s32.totalorder %s1345_s12, 2 }
  0x2c   : > { %1904 = sst [smem:[#allocation28_spill]] %s1903_s26  ;;  %p1493_p3 = por %p166_p1, %p84_p10 }
  0x2d   : > { %s1905_s27 = scalar_select %p1488_p4, 1, 0 }
  0x2e   : > { %s1907_s28 = scalar_select %p1493_p3, 1, 0 }
  0x2f   : > { %1906 = sst [smem:[#allocation29_spill]] %s1905_s27  ;;  %s234_s29 = sand.u32 1, %s1345_s12  }
  0x30   : > { %1908 = sst [smem:[#allocation30_spill]] %s1907_s28  ;;  %s1499_s30 = sand.u32 1, %s1329_s9  }
  0x31   : > { %s1873_s0 = sshll.u32 %s1499_s30, 3  ;;  %s1872_s15 = sshll.u32 %s1345_s12, 7 }
  0x32   : > { %s1909_s2 = sld [smem:[#allocation31_spill]]  ;;  %s238_s19 = scalar_lea.vmem [#allocation7], %s1873_s0 }
  0x33   : > { %s245_s21 = sshll.u32 %s238_s19, 4  ;;  %p1516_p5 = pnand %p1875_p6, %p1470_p12  ;;  %s1520_s21 = int_to_ptr.vmem [resolvable:$true] %s245_s21 }
  0x34   : > { %s896_s25 = sshll.u32 %s1499_s30, 4  ;;  %s1523_s16 = scalar_lea.sflag [#allocation8], %s234_s29 }
  0x35   : > { %s1910_s22 = scalar_select %p1516_p5, 1, 0 }
  0x36   : > { %p1529_p9 = pneg %p1516_p5 }
  0x38   : > { %s1508_s18 = scalar_lea.hbm %s1909_s2, %s1872_s15  ;;  %s1098_s0 = scalar_lea.hbm %s1909_s2, 256 }
  0x39   : > { %s1093_s17 = scalar_lea.hbm %s1508_s18, 128  ;;  %p1099_p12 = scmp.lt.u32.totalorder %s1508_s18, %s1909_s2 }
  0x3a   : > { %p1094_p8 = scmp.ne.s32.totalorder %s1508_s18, %s1093_s17  ;;  %p1100_p0 = scmp.lt.u32.totalorder %s1098_s0, %s1093_s17 }
  0x3b   : > { %p1102_p2 = scmp.lt.u32.totalorder %s1093_s17, %s1508_s18 }
  0x3c   : > { %p1096_p10 = pnand %p1529_p9, %p1094_p8  ;;  %p1101_p1 = por %p1100_p0, %p1099_p12 }
  0x3e   : > { %p1097_p11 = pneg %p1096_p10  ;;  %p1103_p6 = por %p1102_p2, %p1101_p1 }
  0x40   : > { %p1104_p3 = pnand %p1103_p6, %p1097_p11 }
  0x42   : > { %1107 = shalt.err (!%p1104_p3)
}
  0x43   : > { %s1108_s29 = scalar_lea.vmem %s1520_s21, 128  ;;  %s1348_s23 = smov [#allocation7]  }
  0x44   : > { %p1109_p8 = scmp.ne.s32.totalorder %s1520_s21, %s1108_s29  ;;  %s1113_s19 = sshll.u32 %s1348_s23, 4  ;;  %s1114_s19 = int_to_ptr.vmem [resolvable:$false] %s1113_s19 }
  0x45   : > { %s1115_s9 = scalar_lea.vmem %s1114_s19, 256  ;;  %p1116_p13 = scmp.lt.s32.totalorder %s1520_s21, %s1114_s19 }
  0x46   : > { %p1111_p10 = pnand %p1109_p8, %p1529_p9  ;;  %p1117_p7 = scmp.lt.s32.totalorder %s1115_s9, %s1108_s29 }
  0x48   : > { %p1112_p4 = pneg %p1111_p10  ;;  %p1118_p12 = por %p1117_p7, %p1116_p13 }
  0x4a   : > { %p1119_p0 = pnand %p1118_p12, %p1112_p4 }
  0x4c   : > { %1122 = shalt.err (!%p1119_p0)
}
  0x4d   : > { %988 = dma.hbm_to_vmem [thread:$0]  (!%p1516_p5), %s1508_s18, 128, %s1520_s21, %s1523_s16  }
  0x4e   : > { %p1912_p3 = scmp.ne.s32.totalorder %s1341_s11, %s1337_s10  ;;  %p1913_p6 = scmp.eq.s32.totalorder %s1345_s12, 0 }
  0x4f   : > { %p901_p13 = scmp.ge.s32.totalorder %s1345_s12, 1  ;;  %s256_s0 = scalar_lea.vmem [#allocation9], %s896_s25 }
  0x50   : > { %p1558_p7 = por %p1913_p6, %p1912_p3  ;;  %s263_s17 = sshll.u32 %s256_s0, 4  ;;  %s1581_s17 = int_to_ptr.vmem [resolvable:$true] %s263_s17 }
  0x51   : > { %p289_p2 = scmp.lt.s32.totalorder %s1345_s12, 3  ;;  %s1883_s29 = sand.u32 1, %s1341_s11  }
  0x52   : > { %p1915_p4 = scmp.lt.s32.totalorder %s1345_s12, 2  ;;  %s891_s23 = sshll.u32 %s1883_s29, 5 }
  0x53   : > { %p1575_p1 = pnand %p901_p13, %p289_p2  ;;  %s216_s0 = scalar_lea.vmem [#allocation4], %s891_s23 }
  0x54   : > { %p1571_p11 = pnand %p1915_p4, %p1558_p7  ;;  %p1918_p8 = pmov %p1915_p4 }
  0x55   : > { %s1917_s21 = scalar_select %p1575_p1, 1, 0 }
  0x56   : > { %s1916_s18 = scalar_select %p1571_p11, 1, 0 }
  0x57   : > { %s966_s25 = scalar_select %p1558_p7, [#allocation3], [#allocation15] }
  0x58   : > { %s967_s19 = scalar_select %p1558_p7, %s1345_s12, 0 }
  0x59   : > { %s1949_s25 = smov (!%p1918_p8, %s966_s25), [#allocation16]  ;;  %p1919_p10 = pmov %p1915_p4 }
  0x5a   : > { %s1594_s2 = sshll.u32 %s216_s0, 4  ;;  %s921_s14 = sshll.u32 %s1345_s12, 8  ;;  %s1628_s2 = int_to_ptr.vmem [resolvable:$true] %s1594_s2 }
  0x5b   : > { %s1951_s19 = smov (!%p1919_p10, %s967_s19), 0  ;;  %s1920_s3 = sld [smem:[#allocation32_spill]] }
  0x5c   : > { %s1592_s9 = sld [smem:[%s1949_s25 + %s1951_s19]] }
  0x61   : > { %s1600_s29 = scalar_lea.hbm %s1920_s3, %s921_s14  ;;  %s1128_s23 = scalar_lea.hbm %s1920_s3, 512 }
  0x62   : > { %s1123_s24 = scalar_lea.hbm %s1600_s29, 256  ;;  %p1129_p6 = scmp.lt.u32.totalorder %s1600_s29, %s1920_s3 }
  0x63   : > { %p1124_p12 = scmp.ne.s32.totalorder %s1600_s29, %s1123_s24  ;;  %p1130_p7 = scmp.lt.u32.totalorder %s1128_s23, %s1123_s24 }
  0x64   : > { %p1132_p2 = scmp.lt.u32.totalorder %s1123_s24, %s1600_s29 }
  0x65   : > { %p1126_p0 = pnand %p1124_p12, %p1529_p9  ;;  %p1131_p13 = por %p1130_p7, %p1129_p6 }
  0x67   : > { %p1127_p3 = pneg %p1126_p0  ;;  %p1133_p4 = por %p1132_p2, %p1131_p13 }
  0x69   : > { %p1134_p8 = pnand %p1133_p4, %p1127_p3 }
  0x6b   : > { %1137 = shalt.err (!%p1134_p8)
}
  0x6c   : > { %s1138_s7 = scalar_lea.vmem %s1581_s17, 256  ;;  %s1349_s14 = smov [#allocation9]  }
  0x6d   : > { %p1139_p10 = scmp.ne.s32.totalorder %s1581_s17, %s1138_s7  ;;  %s1143_s28 = sshll.u32 %s1349_s14, 4  ;;  %s1144_s28 = int_to_ptr.vmem [resolvable:$false] %s1143_s28 }
  0x6e   : > { %s1145_s6 = scalar_lea.vmem %s1144_s28, 512  ;;  %p1146_p1 = scmp.lt.s32.totalorder %s1581_s17, %s1144_s28 }
  0x6f   : > { %p1141_p12 = pnand %p1139_p10, %p1529_p9  ;;  %p1147_p11 = scmp.lt.s32.totalorder %s1145_s6, %s1138_s7 }
  0x71   : > { %p1142_p0 = pneg %p1141_p12  ;;  %p1148_p6 = por %p1147_p11, %p1146_p1 }
  0x73   : > { %p1149_p7 = pnand %p1148_p6, %p1142_p0 }
  0x75   : > { %1152 = shalt.err (!%p1149_p7)
}
  0x76   : > { %s1350_s24 = smov 128   ;;  %s1351_s25 = smov 8  }
  0x77   : > { %991 = dma.hbm_to_vmem [thread:$0]  (!%p1516_p5), %s1600_s29, 256, %s1581_s17, %s1523_s16, %s1350_s24, %s1350_s24, %s1351_s25  }
  0x78   : > { %s1921_s19 = sshll.u32 %s1499_s30, 3  ;;  %s1922_s7 = sshll.u32 %s1345_s12, 7 }
  0x79   : > { %s277_s23 = scalar_lea.vmem [#allocation10], %s1921_s19  ;;  %s1637_s6 = scalar_lea.hbm %s1868_s4, %s1922_s7 }
  0x7a   : > { %s284_s0 = sshll.u32 %s277_s23, 4  ;;  %s920_s3 = sshll.u32 %s1592_s9, 9  ;;  %s1640_s0 = int_to_ptr.vmem [resolvable:$true] %s284_s0 }
  0x7b   : > { %s1645_s26 = scalar_lea.hbm %s1865_s1, %s920_s3  ;;  %s1923_s16 = sand.u32 1, %s1341_s11  }
  0x7c   : > { %s1649_s17 = scalar_lea.sflag [#allocation5], %s1923_s16  ;;  %s1153_s29 = scalar_lea.hbm %s1645_s26, 512 }
  0x7d   : > { %p1154_p11 = scmp.ne.s32.totalorder %s1645_s26, %s1153_s29  ;;  %p1924_p1 = scmp.ne.s32.totalorder %s1916_s18, 0 }
  0x7e   : > { %s1158_s3 = scalar_lea.hbm %s1865_s1, 2560  ;;  %p1159_p4 = scmp.lt.u32.totalorder %s1645_s26, %s1865_s1 }
  0x7f   : > { %p1155_p3 = pneg %p1924_p1  ;;  %p1160_p8 = scmp.lt.u32.totalorder %s1158_s3, %s1153_s29 }
  0x80   : > { %p1162_p12 = scmp.lt.u32.totalorder %s1153_s29, %s1645_s26 }
  0x81   : > { %p1156_p13 = pnand %p1155_p3, %p1154_p11  ;;  %p1161_p10 = por %p1160_p8, %p1159_p4 }
  0x83   : > { %p1157_p2 = pneg %p1156_p13  ;;  %p1163_p0 = por %p1162_p12, %p1161_p10 }
  0x85   : > { %p1164_p6 = pnand %p1163_p0, %p1157_p2 }
  0x87   : > { %1167 = shalt.err (!%p1164_p6)
}
  0x88   : > { %s1168_s23 = scalar_lea.vmem %s1628_s2, 512  ;;  %s1352_s7 = smov [#allocation4]  }
  0x89   : > { %p1169_p7 = scmp.ne.s32.totalorder %s1628_s2, %s1168_s23  ;;  %s1173_s14 = sshll.u32 %s1352_s7, 4  ;;  %s1174_s14 = int_to_ptr.vmem [resolvable:$false] %s1173_s14 }
  0x8a   : > { %s1175_s28 = scalar_lea.vmem %s1174_s14, 1024  ;;  %p1176_p5 = scmp.lt.s32.totalorder %s1628_s2, %s1174_s14 }
  0x8b   : > { %p1171_p11 = pnand %p1169_p7, %p1155_p3  ;;  %p1177_p4 = scmp.lt.s32.totalorder %s1175_s28, %s1168_s23 }
  0x8d   : > { %p1172_p13 = pneg %p1171_p11  ;;  %p1178_p8 = por %p1177_p4, %p1176_p5 }
  0x8f   : > { %p1179_p10 = pnand %p1178_p8, %p1172_p13 }
  0x91   : > { %1182 = shalt.err (!%p1179_p10)
}
  0x92   : > { %985 = dma.hbm_to_vmem [thread:$0]  (!%p1924_p1), %s1645_s26, 512, %s1628_s2, %s1649_s17, %s1350_s24, %s1350_s24, %s1351_s25  }
  0x93   : > { %s274_s16 = scalar_lea.sflag [#allocation11], %s1499_s30  ;;  %s1183_s29 = scalar_lea.hbm %s1637_s6, 128 }
  0x94   : > { %p1184_p5 = scmp.ne.s32.totalorder %s1637_s6, %s1183_s29  ;;  %s1188_s19 = scalar_lea.hbm %s1868_s4, 256 }
  0x95   : > { %p1189_p12 = scmp.lt.u32.totalorder %s1637_s6, %s1868_s4  ;;  %p1190_p0 = scmp.lt.u32.totalorder %s1188_s19, %s1183_s29 }
  0x96   : > { %p1186_p3 = pnand %p1184_p5, %p1529_p9  ;;  %p1192_p7 = scmp.lt.u32.totalorder %s1183_s29, %s1637_s6 }
  0x97   : > { %p1191_p6 = por %p1190_p0, %p1189_p12 }
  0x98   : > { %p1187_p2 = pneg %p1186_p3 }
  0x99   : > { %p1193_p11 = por %p1192_p7, %p1191_p6 }
  0x9b   : > { %p1194_p13 = pnand %p1193_p11, %p1187_p2 }
  0x9d   : > { %1197 = shalt.err (!%p1194_p13)
}
  0x9e   : > { %s1198_s2 = scalar_lea.vmem %s1640_s0, 128  ;;  %s1353_s26 = smov [#allocation10]  }
  0x9f   : > { %p1199_p1 = scmp.ne.s32.totalorder %s1640_s0, %s1198_s2  ;;  %s1203_s30 = sshll.u32 %s1353_s26, 4  ;;  %s1204_s30 = int_to_ptr.vmem [resolvable:$false] %s1203_s30 }
  0xa0   : > { %s1205_s24 = scalar_lea.vmem %s1204_s30, 256  ;;  %p1206_p10 = scmp.lt.s32.totalorder %s1640_s0, %s1204_s30 }
  0xa1   : > { %p1201_p4 = pnand %p1199_p1, %p1529_p9  ;;  %p1207_p5 = scmp.lt.s32.totalorder %s1205_s24, %s1198_s2 }
  0xa3   : > { %p1202_p8 = pneg %p1201_p4  ;;  %p1208_p3 = por %p1207_p5, %p1206_p10 }
  0xa5   : > { %p1209_p12 = pnand %p1208_p3, %p1202_p8 }
  0xa7   : > { %1212 = shalt.err (!%p1209_p12)
}
  0xa8   : > { %p1925_p2 = scmp.ne.s32.totalorder %s1910_s22, 0  ;;  %p1926_p0 = scmp.ne.s32.totalorder %s1917_s21, 0 }
  0xa9   : > { %s295_s15 = sand.u32 (!%p1926_p0), 1, %s1337_s10   ;;  %p1927_p9 = scmp.ne.s32.totalorder (!%p1926_p0), %s1899_s20, 0 }
  0xaa   : > { %994 = dma.hbm_to_vmem [thread:$0]  (!%p1925_p2), %s1637_s6, 128, %s1640_s0, %s274_s16  }
  0xab   : > { %293 = sbr.rel (%p1926_p0) target bundleno = 1166 (0x48e), region = 36  ;;  %s902_s25 = sshll.u32 (!%p1926_p0), %s295_s15, 5 }
  0xac   : > { %s296_s17 = scalar_lea.sflag (!%p1926_p0), [#allocation5], %s295_s15  ;;  %s299_s27 = scalar_lea.vmem (!%p1926_p0), [#allocation4], %s902_s25 }
  0xb2   : > { %1300 = dma.done.wait (%p1927_p9), %s296_s17, 512  }
  0xb3   : > { %1302 = vsyncadd (%p1927_p9), %s296_s17, 4294966784  ;;  %s1928_s22 = sld [smem:[#allocation28_spill]]  ;;  %s304_s23 = sand.u32 1, %s1441_s13  }
  0xb4   : > { %s1711_s7 = sand.u32 1, %s1325_s8   ;;  %s305_s0 = scalar_lea.sflag [#allocation8], %s304_s23 }
  0xb5   : > { %s903_s21 = sshll.u32 %s1711_s7, 3 }
  0xb6   : > { %s308_s6 = scalar_lea.vmem [#allocation7], %s903_s21 }
  0xb9   : > { %p1929_p6 = scmp.ne.s32.totalorder %s1928_s22, 0 }
  0xbb   : > { %1304 = dma.done.wait (%p1929_p6), %s305_s0, 384  }
  0xbc   : > { %1306 = vsyncadd (%p1929_p6), %s305_s0, 4294966912  ;;  %s904_s20 = sshll.u32 %s1711_s7, 4  ;;  %s323_s28 = scalar_lea.sflag [#allocation11], %s1711_s7 }
  0xbd   : > { %s1719_s14 = scalar_lea.vmem [#allocation9], %s904_s20  ;;  %s1722_s16 = scalar_lea.vmem [#allocation10], %s903_s21 }
  0xbe   : > { %1308 = dma.done.wait (%p1929_p6), %s323_s28, 128  }
  0xbf   : > { %1310 = vsyncadd (%p1929_p6), %s323_s28, 4294967168  ;;  %v1728_v0 = vld [vmem:[%s299_s27] sm:$0xff]  ;;  %v1730_v1 = vld [vmem:[%s299_s27 + $0x8] sm:$0xff]  ;;  %vm385_vm0 = vcmask 261120   ;;  %v1354_v21 = vmov 0.0|0.0   ;;  %vm1355_vm1 = vmmov 0  }
  0xc0   : > { %v1732_v2 = vld [vmem:[%s299_s27 + $0x10] sm:$0xff]  ;;  %v1734_v3 = vld [vmem:[%s299_s27 + $0x18] sm:$0xff]  ;;  %v381_v4 = vmul.f32 %v1728_v0, %v1728_v0  ;;  %v382_v5 = vmul.f32 %v1730_v1, %v1730_v1  ;;  %v1747_v12 = vld [vmem:[%s308_s6] sm:$0xff]  ;;  %950 = vmatprep.subr.bf16.mxu0 %v1354_v21  ;;  %956 = vmatprep.subr.bf16.mxu1 %v1354_v21  ;;  %v1356_v26 = vmov 0.0   ;;  %s1357_s9 = smov 1e-12  }
  0xc1   : > { %v383_v6 = vmul.f32 %v1732_v2, %v1732_v2  ;;  %v384_v7 = vmul.f32 %v1734_v3, %v1734_v3  ;;  %v418_v15 = vmul.f32 %v1747_v12, %v1747_v12  ;;  %940 = vmatprep.mubr.msk.f32.mxu0 %vm1355_vm1, %v1356_v26  ;;  %947 = vmatprep.mubr.msk.f32.mxu1 %vm1355_vm1, %v1356_v26  ;;  %v1754_v27 = vld [vmem:[%s1719_s14] sm:$0xff]  ;;  %v1757_v28 = vld [vmem:[%s1719_s14 + $0x8] sm:$0xff]  ;;  %vm958_vm10 = vmpackc.low %vm385_vm0, %vm385_vm0  ;;  %vm614_vm11 = vcmask 130048   ;;  %s906_s3 = sshll.u32 %s1711_s7, 1  ;;  %s922_s5 = sshll.u32 %s1441_s13, 5 }
  0xc2   : > { %v386_v8 = vsel %vm385_vm0, %v381_v4, 0.0  ;;  %v387_v9 = vsel %vm385_vm0, %v382_v5, 0.0  ;;  %v432_v29 = vmul.f32 %v1754_v27, %v1754_v27  ;;  %v433_v30 = vmul.f32 %v1757_v28, %v1757_v28  ;;  %s365_s2 = scalar_lea.vmem [#allocation12], %s906_s3  ;;  %s372_s30 = scalar_lea.vmem [#allocation13], %s906_s3 }
  0xc3   : > { %v389_v10 = vsel %vm385_vm0, %v383_v6, 0.0  ;;  %v388_v11 = vadd.f32 %v387_v9, %v386_v8  ;;  %v391_v13 = vsel %vm385_vm0, %v384_v7, 0.0  ;;  %v419_v17 = vsel %vm385_vm0, %v418_v15, 0.0  ;;  %s706_s26 = sshll.u32 %s365_s2, 4  ;;  %s720_s24 = sshll.u32 %s372_s30, 4  ;;  %s1784_s26 = int_to_ptr.vmem [resolvable:$true] %s706_s26  ;;  %s1791_s24 = int_to_ptr.vmem [resolvable:$true] %s720_s24 }
  0xc4   : > { %v434_v31 = vsel %vm385_vm0, %v432_v29, 0.0  ;;  %v437_v32 = vsel %vm385_vm0, %v433_v30, 0.0  ;;  %vm654_vm12 = vcmask 64512   ;;  %s1930_s27 = sld [smem:[#allocation33_spill]]  ;;  %s1932_s0 = sld [smem:[#allocation34_spill]] }
  0xc5   : > { %v390_v14 = vadd.f32 %v389_v10, %v388_v11  ;;  %435 = vadd.xlane.f32.xlu1 %v434_v31  ;;  %s1931_s22 = sld [smem:[#allocation29_spill]]  ;;  %s687_s14 = scalar_lea.sflag [#allocation6], %s1711_s7 }
  0xc6   : > { %s1213_s28 = scalar_lea.vmem %s1784_s26, 32 }
  0xc7   : > { %v392_v16 = vadd.f32 %v391_v13, %v390_v14  ;;  %v612_v13 = vld [vmem:[%s1722_s16] sm:$0xff]  ;;  %p1214_p7 = scmp.ne.s32.totalorder %s1784_s26, %s1213_s28  ;;  %s1358_s16 = smov [#allocation12]  }
  0xc9   : > { %393 = vadd.xlane.f32.xlu0 %v392_v16  ;;  %438 = vadd.xlane.f32.xlu1 %v437_v32 }
  0xca   : > { %s1782_s23 = scalar_lea.hbm %s1930_s27, %s922_s5  ;;  %s1933_s6 = smov %s1932_s0 }
  0xcb   : > { %s1789_s20 = scalar_lea.hbm %s1932_s0, %s922_s5  ;;  %p1934_p11 = scmp.ne.s32.totalorder %s1931_s22, 0 }
  0xcd   : > { %420 = vadd.xlane.f32.xlu0 %v419_v17  ;;  %p1215_p13 = pnand %p1214_p7, %p1934_p11 }
  0xcf   : > { %p1216_p1 = pneg %p1215_p13 }
 0x152   : > { %v436_v56 = vpop.xlane.xlu1 %435 }
 0x153   : > { %vm442_vm6 = vcmp.eq.f32.partialorder %v436_v56, inf  ;;  %v445_v59 = vand.u32 2147483648, %v436_v56  ;;  %vm444_vm7 = vcmp.eq.f32.partialorder %v436_v56, 0.0 }
 0x156   : > { %v394_v18 = vpop.xlane.xlu0 %393  ;;  %v439_v57 = vpop.xlane.xlu1 %438 }
 0x157   : > { %v395_v19 = vrot.slane %v394_v18, 4  ;;  %vm449_vm8 = vcmp.eq.f32.partialorder %v439_v57, inf  ;;  %vm451_vm9 = vcmp.eq.f32.partialorder %v439_v57, 0.0 }
 0x159   : > { %v396_v20 = vadd.f32 %v395_v19, %v394_v18 }
 0x15a   : > { %v421_v39 = vpop.xlane.xlu0 %420 }
 0x15b   : > { %v397_v22 = vrot.slane %v396_v20, 2  ;;  %vm424_vm4 = vcmp.eq.f32.partialorder %v421_v39, inf  ;;  %v427_v42 = vand.u32 2147483648, %v421_v39  ;;  %vm426_vm5 = vcmp.eq.f32.partialorder %v421_v39, 0.0 }
 0x15d   : > { %v398_v23 = vadd.f32 %v397_v22, %v396_v20 }
 0x15f   : > { %v399_v24 = vrot.slane %v398_v23, 1 }
 0x161   : > { %v400_v25 = vadd.f32 %v399_v24, %v398_v23 }
 0x163   : > { %960 = vpush %v400_v25 }
 0x194   : > { %s961_s29 = spop %960 }
 0x195   : > { %v402_v33 = vstv %s961_s29  ;;  %s1217_s29 = sshll.u32 %s1358_s16, 4  ;;  %s1218_s29 = int_to_ptr.vmem [resolvable:$false] %s1217_s29 }
 0x196   : > { %1067 = vrsqrt.f32 %v402_v33  ;;  %vm405_vm2 = vcmp.eq.f32.partialorder %v402_v33, inf  ;;  %v408_v36 = vand.u32 2147483648, %v402_v33  ;;  %vm407_vm3 = vcmp.eq.f32.partialorder %v402_v33, 0.0  ;;  %p1220_p4 = scmp.lt.s32.totalorder %s1784_s26, %s1218_s29 }
 0x197   : > { %1069 = vrsqrt.f32 %v421_v39 }
 0x1a0   : > { %v1068_v34 = vpop.eup %1067 }
 0x1a1   : > { %v404_v35 = vmul.f32 %v1068_v34, %v402_v33  ;;  %v1070_v40 = vpop.eup %1069 }
 0x1a2   : > { %v423_v41 = vmul.f32 %v1070_v40, %v421_v39 }
 0x1a3   : > { %v406_v37 = vsel %vm405_vm2, %v402_v33, %v404_v35 }
 0x1a4   : > { %v409_v38 = vsel %vm407_vm3, %v408_v36, %v406_v37  ;;  %v425_v43 = vsel %vm424_vm4, %v421_v39, %v423_v41 }
 0x1a5   : > { %962 = vpush %v409_v38  ;;  %v428_v45 = vsel %vm426_vm5, %v427_v42, %v425_v43  ;;  %v674_v38 = vlaneseq }
 0x1a6   : > { %v429_v46 = vmax.f32 %v428_v45, 1e-12 }
 0x1a7   : > { %vm676_vm13 = vcmp.lt.s32.totalorder %v674_v38, 256  ;;  %vm679_vm14 = vcmp.lt.s32.totalorder %v674_v38, 8  ;;  %vm683_vm15 = vcmp.lt.s32.totalorder %v674_v38, 16 }
 0x1d6   : > { %s963_s18 = spop %962 }
 0x1d7   : > { %s411_s19 = smax.f32 %s1357_s9, %s963_s18  ;;  %s1219_s18 = scalar_lea.vmem %s1218_s29, 64 }
 0x1d8   : > { %v412_v44 = vstv %s411_s19  ;;  %p1221_p8 = scmp.lt.s32.totalorder %s1219_s18, %s1213_s28 }
 0x1d9   : > { %1071 = vrcp.f32 %v412_v44 }
 0x1da   : > { %1073 = vrcp.f32 %v429_v46  ;;  %p1222_p10 = por %p1221_p8, %p1220_p4 }
 0x1db   : > { %1075 = vrsqrt.f32 %v436_v56 }
 0x1dc   : > { %1077 = vrsqrt.f32 %v439_v57  ;;  %p1223_p5 = pnand %p1222_p10, %p1216_p1 }
 0x1e3   : > { %v1072_v47 = vpop.eup %1071 }
 0x1e4   : > { %v414_v48 = vmul.f32 %v1072_v47, %v1728_v0  ;;  %v415_v49 = vmul.f32 %v1072_v47, %v1730_v1  ;;  %v416_v51 = vmul.f32 %v1072_v47, %v1732_v2  ;;  %v417_v52 = vmul.f32 %v1072_v47, %v1734_v3  ;;  %v1074_v53 = vpop.eup %1073 }
 0x1e5   : > { %v431_v55 = vmul.f32 %v1074_v53, %v1747_v12  ;;  %v1076_v58 = vpop.eup %1075  ;;  %v452_v0 = vand.u32 2147483648, %v439_v57 }
 0x1e6   : > { %v951_v50 = vpack.c.bf16 %v415_v49, %v414_v48  ;;  %v954_v54 = vpack.c.bf16 %v417_v52, %v416_v51  ;;  %v441_v60 = vmul.f32 %v1076_v58, %v436_v56  ;;  %v1078_v62 = vpop.eup %1077 }
 0x1e7   : > { %v448_v2 = vmul.f32 %v1078_v62, %v439_v57 }
 0x1e8   : > { %952 = vmatpush3.bf16.msra.mxu0 %v951_v50  ;;  %v443_v61 = vsel %vm442_vm6, %v436_v56, %v441_v60 }
 0x1e9   : > { %953 = vmatprep.subr.bf16.mxu0 %v1354_v21  ;;  %v446_v63 = vsel %vm444_vm7, %v445_v59, %v443_v61  ;;  %v450_v3 = vsel %vm449_vm8, %v439_v57, %v448_v2 }
 0x1ea   : > { %v454_v1 = vmax.f32 %v446_v63, 1e-12  ;;  %v453_v4 = vsel %vm451_vm9, %v452_v0, %v450_v3 }
 0x1eb   : > { %v455_v5 = vmax.f32 %v453_v4, 1e-12 }
 0x1ec   : > { %955 = vmatpush3.bf16.msra.mxu0 %v954_v54  ;;  %1079 = vrcp.f32 %v454_v1 }
 0x1ed   : > { %1081 = vrcp.f32 %v455_v5 }
 0x1ef   : > { %941 = vmatmul.mubr.msk.f32.vlgmr.msra.gmra.mrb[0].mxu0 %vm385_vm0, %v431_v55 }
 0x1f6   : > { %v1080_v6 = vpop.eup %1079 }
 0x1f7   : > { %v457_v7 = vmul.f32 %v1080_v6, %v1754_v27  ;;  %v1082_v8 = vpop.eup %1081 }
 0x1f8   : > { %v459_v9 = vmul.f32 %v1082_v8, %v1757_v28 }
 0x1fa   : > { %v957_v10 = vpack.c.bf16 %v459_v9, %v457_v7 }
 0x1fc   : > { %959 = vmatpush3.bf16.xpose.msk.msra.mxu1 %vm958_vm10, %v957_v10 }
 0x2c2   : > { %v529_v11 = vpop.f32.mrb[0].mxu0 }
 0x2c3   : > { %v942_v12 = vpop.f32.mrb[1].mxu0  ;;  %948 = vmatmul.mubr.msk.f32.vlgmr.msra.gmra.mrb[0].mxu1 %vm385_vm0, %v529_v11 }
 0x396   : > { %v608_v14 = vpop.f32.mrb[0].mxu1 }
 0x397   : > { %v613_v15 = vmul.f32 %v612_v13, %v608_v14  ;;  %v949_v16 = vpop.f32.mrb[1].mxu1 }
 0x399   : > { %622 = vxpose.xlu1.b32.start.end [1/1] (short) (narrow) %v613_v15, 16  ;;  %v615_v17 = vsel %vm614_vm11, %v613_v15, 0.0 }
 0x39a   : > { %664 = vadd.xlane.f32.xlu0 %v615_v17  ;;  %v616_v30 = vrot.slane %v615_v17, 4 }
 0x39c   : > { %v617_v32 = vadd.f32 %v616_v30, %v615_v17 }
 0x39e   : > { %v618_v34 = vrot.slane %v617_v32, 2 }
 0x3a0   : > { %v619_v36 = vadd.f32 %v618_v34, %v617_v32 }
 0x3a2   : > { %v620_v39 = vrot.slane %v619_v36, 1 }
 0x3a4   : > { %v621_v41 = vadd.f32 %v620_v39, %v619_v36 }
 0x419   : > { %v638_v25 = vpop.trf.xlu1 }
 0x41a   : > { %v655_v27 = vsel %vm654_vm12, %v638_v25, 0.0 }
 0x41d   : > { %v639_v26 = vpop.trf.xlu1 }
 0x41e   : > { %v656_v28 = vsel %vm654_vm12, %v639_v26, 0.0 }
 0x41f   : > { %v657_v29 = vadd.f32 %v656_v28, %v655_v27 }
 0x421   : > { %v658_v31 = vrot.slane %v657_v29, 4 }
 0x423   : > { %v659_v33 = vadd.f32 %v658_v31, %v657_v29 }
 0x425   : > { %v660_v35 = vrot.slane %v659_v33, 2 }
 0x427   : > { %v665_v18 = vpop.xlane.xlu0 %664  ;;  %v661_v37 = vadd.f32 %v660_v35, %v659_v33 }
 0x428   : > { %v666_v19 = vrot.slane %v665_v18, 4 }
 0x429   : > { %v662_v40 = vrot.slane %v661_v37, 1 }
 0x42a   : > { %v667_v20 = vadd.f32 %v666_v19, %v665_v18 }
 0x42b   : > { %v663_v42 = vadd.f32 %v662_v40, %v661_v37 }
 0x42c   : > { %v668_v21 = vrot.slane %v667_v20, 2 }
 0x42e   : > { %v669_v22 = vadd.f32 %v668_v21, %v667_v20 }
 0x430   : > { %v670_v23 = vrot.slane %v669_v22, 1 }
 0x432   : > { %v671_v24 = vadd.f32 %v670_v23, %v669_v22 }
 0x434   : > { %964 = vpush %v671_v24 }
 0x465   : > { %s965_s15 = spop %964 }
 0x466   : > { %v673_v43 = vstv %s965_s15 }
 0x467   : > { %678 = vst.msk [vmem:[%s365_s2] sm:$0x3] %vm676_vm13, %v673_v43  ;;  %682 = vst.msk [vmem:[%s372_s30] sm:$0x3] %vm676_vm13, %v673_v43 }
 0x468   : > { %681 = vst.msk [vmem:[%s365_s2] sm:$0x1] %vm679_vm14, %v663_v42 }
 0x469   : > { %685 = vst.msk [vmem:[%s372_s30] sm:$0x1] %vm683_vm15, %v621_v41 }
 0x46a   : > { %1226 = shalt.err (!%p1223_p5)
}
 0x46b   : > { %s1227_s9 = scalar_lea.hbm %s1782_s23, 32  ;;  %s1231_s5 = scalar_lea.hbm %s1930_s27, 64 }
 0x46c   : > { %p1228_p3 = scmp.ne.s32.totalorder %s1782_s23, %s1227_s9  ;;  %p1232_p0 = scmp.lt.u32.totalorder %s1782_s23, %s1930_s27 }
 0x46d   : > { %p1233_p9 = scmp.lt.u32.totalorder %s1231_s5, %s1227_s9  ;;  %p1235_p7 = scmp.lt.u32.totalorder %s1227_s9, %s1782_s23 }
 0x46e   : > { %p1229_p12 = pnand %p1228_p3, %p1934_p11 }
 0x46f   : > { %p1234_p6 = por %p1233_p9, %p1232_p0 }
 0x470   : > { %p1230_p2 = pneg %p1229_p12 }
 0x471   : > { %p1236_p13 = por %p1235_p7, %p1234_p6 }
 0x473   : > { %p1237_p1 = pnand %p1236_p13, %p1230_p2 }
 0x475   : > { %1240 = shalt.err (!%p1237_p1)
}
 0x476   : > { %976 = dma.vmem_to_hbm [thread:$0]  (%p1934_p11), %s1784_s26, 32, %s1782_s23, %s687_s14  }
 0x477   : > { %s692_s15 = scalar_lea.sflag [#allocation14], %s1711_s7  ;;  %s1241_s25 = scalar_lea.vmem %s1791_s24, 32 }
 0x478   : > { %p1242_p4 = scmp.ne.s32.totalorder %s1791_s24, %s1241_s25  ;;  %s1359_s17 = smov [#allocation13]  }
 0x479   : > { %s1245_s13 = sshll.u32 %s1359_s17, 4  ;;  %s1246_s13 = int_to_ptr.vmem [resolvable:$false] %s1245_s13 }
 0x47a   : > { %p1243_p8 = pnand %p1242_p4, %p1934_p11  ;;  %s1247_s21 = scalar_lea.vmem %s1246_s13, 64 }
 0x47b   : > { %p1248_p5 = scmp.lt.s32.totalorder %s1791_s24, %s1246_s13  ;;  %p1249_p3 = scmp.lt.s32.totalorder %s1247_s21, %s1241_s25 }
 0x47c   : > { %p1244_p10 = pneg %p1243_p8 }
 0x47d   : > { %p1250_p12 = por %p1249_p3, %p1248_p5 }
 0x47f   : > { %p1251_p2 = pnand %p1250_p12, %p1244_p10 }
 0x481   : > { %1254 = shalt.err (!%p1251_p2)
}
 0x482   : > { %s1255_s7 = scalar_lea.hbm %s1789_s20, 32  ;;  %s1259_s0 = scalar_lea.hbm %s1933_s6, 64 }
 0x483   : > { %p1256_p0 = scmp.ne.s32.totalorder %s1789_s20, %s1255_s7  ;;  %p1260_p7 = scmp.lt.u32.totalorder %s1789_s20, %s1933_s6 }
 0x484   : > { %p1261_p13 = scmp.lt.u32.totalorder %s1259_s0, %s1255_s7  ;;  %p1263_p4 = scmp.lt.u32.totalorder %s1255_s7, %s1789_s20 }
 0x485   : > { %p1257_p9 = pnand %p1256_p0, %p1934_p11 }
 0x486   : > { %p1262_p1 = por %p1261_p13, %p1260_p7 }
 0x487   : > { %p1258_p6 = pneg %p1257_p9 }
 0x488   : > { %p1264_p8 = por %p1263_p4, %p1262_p1 }
 0x48a   : > { %p1265_p10 = pnand %p1264_p8, %p1258_p6 }
 0x48c   : > { %1268 = shalt.err (!%p1265_p10)
}
 0x48d   : > { %977 = dma.vmem_to_hbm [thread:$0]  (%p1934_p11), %s1791_s24, 32, %s1789_s20, %s692_s15  }
 0x48e PF: > { %s1935_s16 = sld [smem:[#allocation23_spill]]  ;;  %s1936_s29 = sld [smem:[#allocation30_spill]] }
 0x48f   : > { %p1938_p3 = scmp.ge.s32.totalorder %s1345_s12, 2 }
 0x494   : > { %s732_s18 = sand.u32 1, %s1935_s16   ;;  %p1937_p5 = scmp.ne.s32.totalorder %s1936_s29, 0 }
 0x495   : > { %s733_s9 = scalar_lea.sflag [#allocation6], %s732_s18 }
 0x496   : > { %p996_p12 = pnand %p1938_p3, %p1937_p5 }
 0x498   : > { %1312 = dma.done.wait (!%p996_p12), %s733_s9, 32  }
 0x499   : > { %1314 = vsyncadd (!%p996_p12), %s733_s9, 4294967264  ;;  %s742_s19 = scalar_lea.sflag [#allocation14], %s732_s18 }
 0x49a   : > { %1316 = dma.done.wait (!%p996_p12), %s742_s19, 32  }
 0x49b   : > { %1318 = vsyncadd (!%p996_p12), %s742_s19, 4294967264  ;;  %s1939_s12 = sld [smem:[#allocation25_spill]]  ;;  %s1940_s22 = sld [smem:[#allocation24_spill]] }
 0x49c   : > { %s1941_s9 = sld [smem:[#allocation26_spill]]  ;;  %s1942_s24 = sld [smem:[#allocation27_spill]] }
 0x49d   : > { %s1943_s7 = smov %s1325_s8  ;;  %s1945_s0 = smov %s1337_s10 }
 0x49e   : > { %s1946_s10 = smov %s1341_s11 }
 0x4a1   : > { %p33_p11 = scmp.ge.s32.totalorder %s1939_s12, 4   ;;  %s1944_s8 = smov %s1940_s22 }
 0x4a2   : > { %s1947_s11 = smov %s1942_s24 }
 0x4a3   :  { %35 = sbr.rel (!%p33_p11) target bundleno = 26 (0x1a), region = 135 }
 0x4aa   :  { %747 = vsyncpa [#allocation5], 1 }
 0x4ab   :  { %749 = vsyncpa [#allocation5 + $0x1], 1 }
 0x4ac   :  { %750 = vsyncpa [#allocation8], 1 }
 0x4ad   :  { %752 = vsyncpa [#allocation8 + $0x1], 1 }
 0x4ae   :  { %753 = vsyncpa [#allocation11], 1 }
 0x4af   :  { %755 = vsyncpa [#allocation11 + $0x1], 1 }
 0x4b0   :  { %756 = vsyncpa [#allocation6], 1 }
 0x4b1   :  { %758 = vsyncpa [#allocation6 + $0x1], 1 }
 0x4b2   :  { %759 = vsyncpa [#allocation14], 1 }
 0x4b3   :  { %761 = vsyncpa [#allocation14 + $0x1], 1 }

</bundles_post_ra>
